<compile_context>
chip_gen: v7x
topology: tpu7x:2x2x1
jax: 0.10.0
libtpu: 0.0.40
codegen_flags: <defaults>
</compile_context>

<pallas_src>
import functools
import math

import jax
import jax.numpy as jnp
from jax.experimental import pallas as pl
from jax.experimental.pallas import tpu as pltpu


def _round_up(x, m):
    return ((x + m - 1) // m) * m


def _fused_mlp_kernel(*refs, relu_flags, res_flags):
    """All MLP layers for one row tile.

    refs = (x_ref, w_0, b_0, w_1, b_1, ..., w_{L-1}, b_{L-1}, o_ref)
      x_ref : [tm, d0_pad]              padded input rows (pipelined)
      w_i   : [din_i_pad, dout_i_pad]   bf16, VMEM-resident (stored as W^T)
      b_i   : [1, dout_i_pad]           f32,  VMEM-resident
      o_ref : [tm, dlast_pad]           padded output rows (pipelined)

    The running activation is carried as a value through the statically
    unrolled layer loop; no scratch buffer, no extra VMEM copies.
    """
    n_layers = len(relu_flags)
    x_ref = refs[0]
    w_refs = refs[1:1 + 2 * n_layers:2]
    b_refs = refs[2:2 + 2 * n_layers:2]
    o_ref = refs[1 + 2 * n_layers]

    h = x_ref[...].astype(jnp.float32)
    for i in range(n_layers):
        acc = jnp.dot(h.astype(jnp.bfloat16), w_refs[i][...],
                      preferred_element_type=jnp.float32)
        acc = acc + b_refs[i][...]            # bias on the f32 accumulator
        if relu_flags[i]:
            acc = jnp.maximum(acc, 0.0)
        if res_flags[i]:                      # gated on TRUE dims (static)
            acc = acc + h
        h = acc
    o_ref[...] = h.astype(o_ref.dtype)


def _fused_mlp(x_pad, w_list, b_list, *, relu_flags, res_flags, tm):
    """x_pad: [N_pad, d0_pad]; w_list[i]: [din_i_pad, dout_i_pad] bf16."""
    n_pad, d0 = x_pad.shape
    n_layers = len(w_list)
    d_last = w_list[-1].shape[1]
    grid = (n_pad // tm,)

    kernel = functools.partial(
        _fused_mlp_kernel,
        relu_flags=tuple(relu_flags),
        res_flags=tuple(res_flags),
    )

    # Advisory cost hint for XLA scheduling around the custom call.
    flops = sum(2 * n_pad * w.shape[0] * w.shape[1] for w in w_list)
    bytes_accessed = (
        x_pad.size * x_pad.dtype.itemsize
        + sum(w.size * w.dtype.itemsize for w in w_list)
        + sum(b.size * b.dtype.itemsize for b in b_list)
        + n_pad * d_last * x_pad.dtype.itemsize
    )
    cost = pl.CostEstimate(flops=flops, transcendentals=0,
                           bytes_accessed=bytes_accessed)

    # VMEM budget: double-buffered x/out row tiles + single-buffered resident
    # weights/biases + headroom for per-layer f32 activation temporaries.
    d_max = max([d0, d_last] + [w.shape[1] for w in w_list])
    vmem_need = (
        2 * tm * d0 * x_pad.dtype.itemsize
        + 2 * tm * d_last * x_pad.dtype.itemsize
        + sum(w.size * w.dtype.itemsize for w in w_list)
        + sum(b.size * b.dtype.itemsize for b in b_list)
        + 3 * tm * d_max * 4
    )
    try:
        vmem_cap = pltpu.get_tpu_info().vmem_capacity_bytes
    except Exception:
        vmem_cap = 64 * 1024 * 1024          # conservative (v7x per-TC)
    budget = int(vmem_cap * 0.85)
    vmem_limit = min(max(2 * vmem_need, 16 * 1024 * 1024), budget)
    vmem_limit = max(vmem_limit, vmem_need + (2 << 20))  # never below true need

    # Weights/biases: untiled, VMEM-resident (single-buffered, DMA'd once).
    resident_spec = pl.BlockSpec(memory_space=pltpu.MemorySpace.VMEM)
    in_specs = [pl.BlockSpec((tm, d0), lambda i: (i, 0))]
    operands = [x_pad]
    for w, b in zip(w_list, b_list):
        in_specs += [resident_spec, resident_spec]
        operands += [w, b]

    return pl.pallas_call(
        kernel,
        out_shape=jax.ShapeDtypeStruct((n_pad, d_last), x_pad.dtype),
        grid_spec=pltpu.PrefetchScalarGridSpec(
            num_scalar_prefetch=0,
            grid=grid,
            in_specs=in_specs,
            out_specs=pl.BlockSpec((tm, d_last), lambda i: (i, 0)),
        ),
        compiler_params=pltpu.CompilerParams(
            dimension_semantics=("parallel",),
            vmem_limit_bytes=vmem_limit,
        ),
        cost_estimate=cost,
    )(*operands)


class MultiLayerPerceptronPallas:
    """JAX/Pallas port of MultiLayerPerceptron (no batch_norm, no dropout)."""

    LANE = 128      # feature-dim padding target (lane width)
    MAX_TM = 512    # row-tile cap (multiple of 8)

    def __init__(self, input_dim, hidden_dims, short_cut=False, key=None):
        if not isinstance(hidden_dims, (list, tuple)):
            hidden_dims = [hidden_dims]
        self.dims = [input_dim] + list(hidden_dims)
        self.short_cut = short_cut
        if key is None:
            key = jax.random.PRNGKey(0)

        n_layers = len(self.dims) - 1

        # Per-layer static epilogue flags (residual gated on TRUE dims).
        self.relu_flags = [i < n_layers - 1 for i in range(n_layers)]
        self.res_flags = [
            short_cut and self.dims[i] == self.dims[i + 1] for i in range(n_layers)
        ]

        # nn.Linear-style init; weights stored as W^T ([d_in, d_out]),
        # independently zero-padded per layer to lane multiples, cast to bf16
        # for the MXU (padded rows/cols exactly zero). Bias stays f32.
        self.weights = []   # unpadded f32, for the pure-JAX reference
        self.biases = []
        self.w_pads = []    # [din_pad, dout_pad] bf16
        self.b_pads = []    # [1, dout_pad]       f32
        for i in range(n_layers):
            d_in, d_out = self.dims[i], self.dims[i + 1]
            din_p = _round_up(d_in, self.LANE)
            dout_p = _round_up(d_out, self.LANE)
            key, wk, bk = jax.random.split(key, 3)
            bound = 1.0 / math.sqrt(d_in)
            w = jax.random.uniform(wk, (d_in, d_out), jnp.float32, -bound, bound)
            b = jax.random.uniform(bk, (d_out,), jnp.float32, -bound, bound)
            self.weights.append(w)
            self.biases.append(b)
            w_pad = jnp.zeros((din_p, dout_p), jnp.float32).at[:d_in, :d_out].set(w)
            self.w_pads.append(w_pad.astype(jnp.bfloat16))
            self.b_pads.append(jnp.zeros((1, dout_p), jnp.float32).at[0, :d_out].set(b))

    def __call__(self, x):
        n, d_in = x.shape
        assert d_in == self.dims[0], (d_in, self.dims[0])
        d0_pad = self.w_pads[0].shape[0]
        d_last = self.dims[-1]

        # Row tile: multiple of 8, capped at MAX_TM, chosen so the row grid
        # has >= 2 steps whenever the batch allows (v7x megacore).
        if n <= 8:
            tm = 8
        else:
            tm = min(self.MAX_TM, _round_up((n + 1) // 2, 8))
        n_pad = _round_up(n, tm)

        # Zero-pad rows / feature lanes only when actually needed
        # (padded lanes stay exactly zero through bias, ReLU and residual).
        if n_pad == n and d0_pad == d_in:
            x_pad = x
        else:
            x_pad = jnp.zeros((n_pad, d0_pad), x.dtype).at[:n, :d_in].set(x)
        # TODO(synk): when d_in % 128 == 0, handle the ragged last row tile
        # in-kernel (masked store) to avoid this wrapper-side pad/slice copy.

        out_pad = _fused_mlp(
            x_pad,
            self.w_pads,
            self.b_pads,
            relu_flags=self.relu_flags,
            res_flags=self.res_flags,
            tm=tm,
        )
        if out_pad.shape == (n, d_last):
            return out_pad
        return out_pad[:n, :d_last]


def _reference(x, mlp):
    """Pure-JAX reference (unpadded f32 weights) for correctness check."""
    h = x
    n_layers = len(mlp.weights)
    for i in range(n_layers):
        new = h @ mlp.weights[i] + mlp.biases[i]
        if i < n_layers - 1:
            new = jnp.maximum(new, 0.0)
        if mlp.short_cut and new.shape == h.shape:
            new = new + h
        h = new
    return h


if __name__ == "__main__":
    key = jax.random.PRNGKey(0)
    key, xk = jax.random.split(key)

    batch = 256             # -> tm=128, row grid of 2 (exercises pipelining + megacore)
    input_dim = 32
    hidden_dims = [32, 16]

    x = jax.random.normal(xk, (batch, input_dim), jnp.float32)

    mlp = MultiLayerPerceptronPallas(input_dim, hidden_dims, short_cut=True, key=key)

    out = jax.block_until_ready(mlp(x))

    ref = _reference(x, mlp)
    assert out.shape == (batch, hidden_dims[-1]), out.shape
    # bf16 MXU operands (f32 accumulation) -> looser tolerance vs the f32 ref.
    err = float(jnp.max(jnp.abs(out - ref)))
    assert jnp.allclose(out, ref, atol=5e-2, rtol=5e-2), f"mismatch vs reference, max_abs_err={err}"

    print("KERNEL_OK")
</pallas_src>

<mosaic_0001>
module attributes {stable_mosaic.version = 11 : i64} {
  func.func @_fused_mlp_kernel(%arg0: i32, %arg1: memref<128x128xf32, #tpu.memory_space<vmem>>, %arg2: memref<128x128xbf16, #tpu.memory_space<vmem>>, %arg3: memref<1x128xf32, #tpu.memory_space<vmem>>, %arg4: memref<128x128xbf16, #tpu.memory_space<vmem>>, %arg5: memref<1x128xf32, #tpu.memory_space<vmem>>, %arg6: memref<128x128xf32, #tpu.memory_space<vmem>>) attributes {dimension_semantics = [#tpu.dimension_semantics<parallel>], iteration_bounds = array<i64: 2>, scalar_prefetch = 0 : i64, scratch_operands = 0 : i64, tpu.core_type = #tpu.core_type<tc>, window_params = [{transform_indices = @transform_0, window_bounds = array<i64: 128, 128>}, {pipeline_mode = #tpu.pipeline_mode<synchronous>, transform_indices = @transform_1, window_bounds = array<i64: 128, 128>}, {pipeline_mode = #tpu.pipeline_mode<synchronous>, transform_indices = @transform_2, window_bounds = array<i64: 1, 128>}, {pipeline_mode = #tpu.pipeline_mode<synchronous>, transform_indices = @transform_3, window_bounds = array<i64: 128, 128>}, {pipeline_mode = #tpu.pipeline_mode<synchronous>, transform_indices = @transform_4, window_bounds = array<i64: 1, 128>}, {transform_indices = @transform_5, window_bounds = array<i64: 128, 128>}]} {
    %c0 = arith.constant 0 : index
    %c0_0 = arith.constant 0 : index
    %0 = vector.load %arg1[%c0, %c0_0] : memref<128x128xf32, #tpu.memory_space<vmem>>, vector<128x128xf32>
    %1 = arith.truncf %0 : vector<128x128xf32> to vector<128x128xbf16>
    %c0_1 = arith.constant 0 : index
    %c0_2 = arith.constant 0 : index
    %2 = vector.load %arg2[%c0_1, %c0_2] : memref<128x128xbf16, #tpu.memory_space<vmem>>, vector<128x128xbf16>
    %cst = arith.constant dense<0.000000e+00> : vector<128x128xf32>
    %3 = tpu.matmul %1, %2, %cst {dimension_numbers = #tpu.dot_dimension_numbers<[1], [0], [0], [1], [0, 0, 1, 1], [], []>} : vector<128x128xbf16>, vector<128x128xbf16>, vector<128x128xf32> -> vector<128x128xf32>
    %c0_3 = arith.constant 0 : index
    %c0_4 = arith.constant 0 : index
    %4 = vector.load %arg3[%c0_3, %c0_4] : memref<1x128xf32, #tpu.memory_space<vmem>>, vector<1x128xf32>
    %5 = vector.broadcast %4 : vector<1x128xf32> to vector<128x128xf32>
    %6 = arith.addf %3, %5 : vector<128x128xf32>
    %cst_5 = arith.constant 0.000000e+00 : f32
    %7 = vector.broadcast %cst_5 : f32 to vector<128x128xf32>
    %8 = arith.maximumf %6, %7 : vector<128x128xf32>
    %9 = arith.addf %8, %0 : vector<128x128xf32>
    %10 = arith.truncf %9 : vector<128x128xf32> to vector<128x128xbf16>
    %c0_6 = arith.constant 0 : index
    %c0_7 = arith.constant 0 : index
    %11 = vector.load %arg4[%c0_6, %c0_7] : memref<128x128xbf16, #tpu.memory_space<vmem>>, vector<128x128xbf16>
    %cst_8 = arith.constant dense<0.000000e+00> : vector<128x128xf32>
    %12 = tpu.matmul %10, %11, %cst_8 {dimension_numbers = #tpu.dot_dimension_numbers<[1], [0], [0], [1], [0, 0, 1, 1], [], []>} : vector<128x128xbf16>, vector<128x128xbf16>, vector<128x128xf32> -> vector<128x128xf32>
    %c0_9 = arith.constant 0 : index
    %c0_10 = arith.constant 0 : index
    %13 = vector.load %arg5[%c0_9, %c0_10] : memref<1x128xf32, #tpu.memory_space<vmem>>, vector<1x128xf32>
    %14 = vector.broadcast %13 : vector<1x128xf32> to vector<128x128xf32>
    %15 = arith.addf %12, %14 : vector<128x128xf32>
    %c0_11 = arith.constant 0 : index
    %c0_12 = arith.constant 0 : index
    %16 = vector.load %arg6[%c0_11, %c0_12] : memref<128x128xf32, #tpu.memory_space<vmem>>, vector<128x128xf32>
    tpu.vector_store %arg6[%c0_11, %c0_12], %15 {strides = array<i32>} : memref<128x128xf32, #tpu.memory_space<vmem>>, vector<128x128xf32>,
    return
  }
  func.func @transform_0(%arg0: i32) -> (i32, i32) {
    %c0_i32 = arith.constant 0 : i32
    %c0_i32_0 = arith.constant 0 : i32
    return %arg0, %c0_i32 : i32, i32
  }
  func.func @transform_1(%arg0: i32) -> (i32, i32) {
    %c0_i32 = arith.constant 0 : i32
    %c0_i32_0 = arith.constant 0 : i32
    %c0_i32_1 = arith.constant 0 : i32
    return %c0_i32, %c0_i32_0 : i32, i32
  }
  func.func @transform_2(%arg0: i32) -> (i32, i32) {
    %c0_i32 = arith.constant 0 : i32
    %c0_i32_0 = arith.constant 0 : i32
    %c0_i32_1 = arith.constant 0 : i32
    return %c0_i32, %c0_i32_0 : i32, i32
  }
  func.func @transform_3(%arg0: i32) -> (i32, i32) {
    %c0_i32 = arith.constant 0 : i32
    %c0_i32_0 = arith.constant 0 : i32
    %c0_i32_1 = arith.constant 0 : i32
    return %c0_i32, %c0_i32_0 : i32, i32
  }
  func.func @transform_4(%arg0: i32) -> (i32, i32) {
    %c0_i32 = arith.constant 0 : i32
    %c0_i32_0 = arith.constant 0 : i32
    %c0_i32_1 = arith.constant 0 : i32
    return %c0_i32, %c0_i32_0 : i32, i32
  }
  func.func @transform_5(%arg0: i32) -> (i32, i32) {
    %c0_i32 = arith.constant 0 : i32
    %c0_i32_0 = arith.constant 0 : i32
    return %arg0, %c0_i32 : i32, i32
  }
}

</mosaic_0001>

<bundles_post_ra>
// kernel: tpu_custom_call.1
= control target key start
LH: loop header
LB: loop body
LE: loop exit
PB: predicated region body
PF: predicated region fallthrough
CT: control target
= control target key end

     0   :  { %10 = vsyncpa [#allocation3], 0  ;;  %s1565_s0 = inlined_call_operand.hbm [shape: f32[256,128], index: 0, kind: input, shape index: {}]   ;;  %s1566_s1 = inlined_call_operand.hbm [shape: bf16[128,128], index: 1, kind: input, shape index: {}]   ;;  %s1567_s2 = inlined_call_operand.vmem [shape: f32[1,128], index: 2, kind: input, shape index: {}]   ;;  %s1568_s3 = inlined_call_operand.hbm [shape: bf16[128,128], index: 3, kind: input, shape index: {}]   ;;  %s1569_s4 = inlined_call_operand.vmem [shape: f32[1,128], index: 4, kind: input, shape index: {}]   ;;  %s1570_s5 = inlined_call_operand.hbm [shape: f32[256,128], index: 5, kind: output, shape index: {}]  }
   0x1   :  { %12 = vsyncpa [#allocation3 + $0x1], 0 }
   0x2   :  { %13 = vsyncpa [#allocation6], 0 }
   0x3   :  { %14 = vsyncpa [#allocation4], 0 }
   0x4   :  { %16 = vsyncpa [#allocation4 + $0x1], 0  ;;  %s1218_s18 = smov 0   ;;  %s1220_s19 = smov 0  }
   0x5   :  { %s1222_s20 = smov 0   ;;  %s1224_s21 = smov 0  }
   0x6 LB: > { %s1239_s22 = sadd.s32 4294967295, %s1176_s21   ;;  %s797_s23 = sadd.s32 4294967294, %s1176_s21   ;;  %s1176_s21 = sphi %s1224_s21, %s1590_s21   ;;  %s1172_s20 = sphi %s1222_s20, %s1589_s20   ;;  %s1168_s19 = sphi %s1220_s19, %s1588_s19   ;;  %s1164_s18 = sphi %s1218_s18, %s1587_s18  }
   0x7   : > { %p42_p0 = scmp.ne.s32.totalorder %s1168_s19, %s1164_s18  ;;  %p1571_p1 = scmp.eq.s32.totalorder %s1239_s22, 0 }
   0x8   : > { %p156_p3 = scmp.eq.s32.totalorder %s797_s23, 1  ;;  %p798_p5 = scmp.ge.s32.totalorder %s1176_s21, 1 }
   0x9   : > { %p1248_p4 = por %p1571_p1, %p42_p0  ;;  %p163_p7 = scmp.lt.s32.totalorder %s1176_s21, 3 }
   0xa   : > { %p1253_p6 = por %p156_p3, %p42_p0  ;;  %s1178_s27 = smov [#allocation5]  }
   0xb   : > { %s1574_s24 = scalar_select %p1248_p4, 1, 0 }
   0xc   : > { %s1575_s25 = scalar_select %p1253_p6, 1, 0 }
   0xd   : > { %p1258_p8 = pnand %p798_p5, %p163_p7  ;;  %s175_s28 = sshll.u32 %s1178_s27, 4  ;;  %s1262_s28 = int_to_ptr.vmem [resolvable:$true] %s175_s28 }
   0xe   : > { %s1179_s30 = smov [#allocation7]   ;;  %s1020_s9 = scalar_lea.hbm %s1566_s1, 1024 }
   0xf   : > { %p943_p9 = pneg %p1258_p8  ;;  %s191_s6 = sshll.u32 %s1179_s30, 4  ;;  %s1273_s6 = int_to_ptr.vmem [resolvable:$true] %s191_s6 }
  0x10   : > { %p1021_p12 = scmp.ne.s32.totalorder %s1566_s1, %s1020_s9  ;;  %p1027_p5 = scmp.lt.u32.totalorder %s1020_s9, %s1566_s1 }
  0x11   : > { %p1269_p11 = pnand %p943_p9, %p1571_p1 }
  0x13   : > { %p1022_p13 = pneg %p1269_p11 }
  0x15   : > { %p1023_p0 = pnand %p1022_p13, %p1021_p12 }
  0x17   : > { %p1024_p3 = pneg %p1023_p0 }
  0x19   : > { %p1029_p7 = pnand %p1027_p5, %p1024_p3 }
  0x1b   : > { %1032 = shalt.err (!%p1029_p7)
}
  0x1c   : > { %s1033_s14 = scalar_lea.vmem %s1262_s28, 1024  ;;  %p1041_p2 = scmp.lt.s32.totalorder %s1262_s28, %s1262_s28 }
  0x1d   : > { %p1034_p9 = scmp.ne.s32.totalorder %s1262_s28, %s1033_s14  ;;  %p1042_p12 = scmp.lt.s32.totalorder %s1033_s14, %s1033_s14 }
  0x1f   : > { %p1036_p10 = pnand %p1034_p9, %p1022_p13  ;;  %p1043_p0 = por %p1042_p12, %p1041_p2 }
  0x21   : > { %p1037_p1 = pneg %p1036_p10 }
  0x23   : > { %p1044_p6 = pnand %p1043_p0, %p1037_p1 }
  0x25   : > { %1047 = shalt.err (!%p1044_p6)
}
  0x26   : > { %s1180_s15 = smov 64   ;;  %s1181_s16 = smov 4  }
  0x27   : > { %946 = dma.hbm_to_vmem [thread:$0]  (!%p1269_p11), %s1566_s1, 1024, %s1262_s28, [#allocation6], %s1180_s15, %s1180_s15, %s1181_s16  }
  0x28   : > { %s1048_s7 = scalar_lea.hbm %s1568_s3, 1024 }
  0x29   : > { %p1049_p2 = scmp.ne.s32.totalorder %s1568_s3, %s1048_s7  ;;  %p1055_p10 = scmp.lt.u32.totalorder %s1048_s7, %s1568_s3 }
  0x2b   : > { %p1051_p1 = pnand %p1049_p2, %p1022_p13 }
  0x2d   : > { %p1052_p6 = pneg %p1051_p1 }
  0x2f   : > { %p1057_p3 = pnand %p1055_p10, %p1052_p6 }
  0x31   : > { %1060 = shalt.err (!%p1057_p3)
}
  0x32   : > { %s1061_s28 = scalar_lea.vmem %s1273_s6, 1024  ;;  %p1069_p12 = scmp.lt.s32.totalorder %s1273_s6, %s1273_s6 }
  0x33   : > { %p1062_p5 = scmp.ne.s32.totalorder %s1273_s6, %s1061_s28  ;;  %p1070_p0 = scmp.lt.s32.totalorder %s1061_s28, %s1061_s28 }
  0x35   : > { %p1064_p7 = pnand %p1062_p5, %p1022_p13  ;;  %p1071_p2 = por %p1070_p0, %p1069_p12 }
  0x37   : > { %p1065_p9 = pneg %p1064_p7 }
  0x39   : > { %p1072_p1 = pnand %p1071_p2, %p1065_p9 }
  0x3b   : > { %1075 = shalt.err (!%p1072_p1)
}
  0x3c   : > { %949 = dma.hbm_to_vmem [thread:$0]  (!%p1269_p11), %s1568_s3, 1024, %s1273_s6, [#allocation6], %s1180_s15, %s1180_s15, %s1181_s16  }
  0x3d   : > { %s1328_s14 = sadd.s32 1, %s1176_s21   ;;  %s29_s29 = sadd.s32 1, %s1172_s20 }
  0x3e   : > { %s26_s17 = ssub.s32 %s1176_s21, %s1328_s14  ;;  %p36_p13 = scmp.ne.s32.totalorder %s1172_s20, %s1168_s19 }
  0x3f   : > { %p27_p6 = scmp.eq.s32.totalorder %s26_s17, 0  ;;  %p37_p10 = scmp.eq.s32.totalorder %s1176_s21, 0 }
  0x40   : > { %p1578_p3 = scmp.eq.s32.totalorder %s1239_s22, 1  ;;  %p960_p7 = scmp.lt.s32.totalorder %s1176_s21, 2 }
  0x41   : > { %s1344_s27 = scalar_select %p27_p6, %s1172_s20, %s29_s29  }
  0x42   : > { %p1338_p5 = por %p1578_p3, %p36_p13  ;;  %p38_p9 = por %p37_p10, %p36_p13 }
  0x43   : > { %s208_s30 = sand.u32 1, %s1172_s20   ;;  %s833_s6 = sshll.u32 %s1176_s21, 11 }
  0x44   : > { %s1579_s23 = scalar_select %p1338_p5, 1, 0 }
  0x45   : > { %s802_s7 = sshll.u32 %s208_s30, 7  ;;  %s1351_s8 = scalar_lea.hbm %s1565_s0, %s833_s6 }
  0x46   : > { %s212_s9 = scalar_lea.vmem [#allocation2], %s802_s7  ;;  %p1355_p11 = pnand %p960_p7, %p38_p9 }
  0x47   : > { %s219_s10 = sshll.u32 %s212_s9, 4  ;;  %s1359_s28 = scalar_lea.sflag [#allocation3], %s208_s30  ;;  %s1353_s10 = int_to_ptr.vmem [resolvable:$true] %s219_s10 }
  0x48   : > { %s1076_s12 = scalar_lea.hbm %s1351_s8, 2048  ;;  %p1078_p0 = pneg %p1355_p11 }
  0x49   : > { %p1077_p12 = scmp.ne.s32.totalorder %s1351_s8, %s1076_s12  ;;  %s1081_s17 = scalar_lea.hbm %s1565_s0, 4096 }
  0x4a   : > { %p1082_p13 = scmp.lt.u32.totalorder %s1351_s8, %s1565_s0  ;;  %p1083_p6 = scmp.lt.u32.totalorder %s1081_s17, %s1076_s12 }
  0x4b   : > { %p1079_p2 = pnand %p1078_p0, %p1077_p12  ;;  %p1085_p3 = scmp.lt.u32.totalorder %s1076_s12, %s1351_s8 }
  0x4c   : > { %p1084_p10 = por %p1083_p6, %p1082_p13 }
  0x4d   : > { %p1080_p1 = pneg %p1079_p2 }
  0x4e   : > { %p1086_p7 = por %p1085_p3, %p1084_p10 }
  0x50   : > { %p1087_p9 = pnand %p1086_p7, %p1080_p1 }
  0x52   : > { %1090 = shalt.err (!%p1087_p9)
}
  0x53   : > { %s1091_s30 = scalar_lea.vmem %s1353_s10, 2048  ;;  %s1182_s15 = smov [#allocation2]  }
  0x54   : > { %p1092_p12 = scmp.ne.s32.totalorder %s1353_s10, %s1091_s30  ;;  %s1096_s16 = sshll.u32 %s1182_s15, 4  ;;  %s1097_s16 = int_to_ptr.vmem [resolvable:$false] %s1096_s16 }
  0x55   : > { %s1098_s9 = scalar_lea.vmem %s1097_s16, 4096  ;;  %p1099_p4 = scmp.lt.s32.totalorder %s1353_s10, %s1097_s16 }
  0x56   : > { %p1094_p2 = pnand %p1092_p12, %p1078_p0  ;;  %p1100_p13 = scmp.lt.s32.totalorder %s1098_s9, %s1091_s30 }
  0x58   : > { %p1095_p5 = pneg %p1094_p2  ;;  %p1101_p6 = por %p1100_p13, %p1099_p4 }
  0x5a   : > { %p1102_p10 = pnand %p1101_p6, %p1095_p5 }
  0x5c   : > { %1105 = shalt.err (!%p1102_p10)
}
  0x5d   : > { %s1183_s12 = smov 128   ;;  %s1184_s13 = smov 8  }
  0x5e   : > { %953 = dma.hbm_to_vmem [thread:$0]  (!%p1355_p11), %s1351_s8, 2048, %s1353_s10, %s1359_s28, %s1183_s12, %s1183_s12, %s1184_s13  }
  0x5f   : > { %231 = sbr.rel (%p1258_p8) target bundleno = 619 (0x26b), region = 40  ;;  %s1390_s29 = sand.u32 (!%p1258_p8), 1, %s1168_s19  }
  0x60   : > { %s806_s17 = sshll.u32 (!%p1258_p8), %s1390_s29, 7  ;;  %s234_s7 = scalar_lea.sflag (!%p1258_p8), [#allocation3], %s1390_s29 }
  0x61   : > { %s1396_s6 = scalar_lea.vmem (!%p1258_p8), [#allocation2], %s806_s17  ;;  %p1581_p4 = scmp.ne.s32.totalorder (!%p1258_p8), %s1574_s24, 0 }
  0x66   : > { %1151 = dma.done.wait (%p1581_p4), %s234_s7, 2048  }
  0x67   : > { %1153 = vsyncadd (%p1581_p4), %s234_s7, 4294965248  ;;  %p1582_p5 = scmp.eq.s32.totalorder %s1239_s22, 0 }
  0x69   : > { %1155 = dma.done.wait (%p1582_p5), [#allocation6], 2048   ;;  %p1583_p8 = pmov %p1582_p5 }
  0x6a   : > { %v1004_v0 = vld [vmem:[#allocation5] sm:$0xff]   ;;  %v1005_v1 = vld [vmem:[#allocation5 + $0x8] sm:$0xff]   ;;  %v1006_v2 = vld [vmem:[#allocation5 + $0x10] sm:$0xff]   ;;  %s1496_s11 = scalar_lea.vmem [#allocation8], %s806_s17  ;;  %s834_s28 = sshll.u32 %s1239_s22, 11 }
  0x6b   : > { %1157 = vsyncadd (%p1583_p8), [#allocation6], 4294965248  ;;  %867 = vmatprep.subr.bf16.mxu0 %v1004_v0  ;;  %v1007_v3 = vld [vmem:[#allocation5 + $0x18] sm:$0xff]   ;;  %v1407_v4 = vld [vmem:[%s1396_s6] sm:$0xff]  ;;  %s705_s30 = sshll.u32 %s1496_s11, 4  ;;  %s1516_s9 = scalar_lea.hbm %s1570_s5, %s834_s28  ;;  %s1518_s30 = int_to_ptr.vmem [resolvable:$true] %s705_s30 }
  0x6c   : > { %868 = vmatpush3.bf16.msra.mxu0 %v1004_v0  ;;  %v1410_v5 = vld [vmem:[%s1396_s6 + $0x8] sm:$0xff]  ;;  %v1008_v7 = vld [vmem:[#allocation5 + $0x20] sm:$0xff]   ;;  %v1014_v11 = vld [vmem:[#allocation7 + $0x10] sm:$0xff]   ;;  %s692_s22 = scalar_lea.sflag [#allocation4], %s1390_s29  ;;  %s1106_s12 = scalar_lea.vmem %s1518_s30, 2048 }
  0x6d   : > { %869 = vmatprep.subr.bf16.mxu0 %v1005_v1  ;;  %v291_v6 = vpack.c.bf16 %v1410_v5, %v1407_v4  ;;  %v1012_v8 = vld [vmem:[#allocation7] sm:$0xff]   ;;  %v1013_v9 = vld [vmem:[#allocation7 + $0x8] sm:$0xff]   ;;  %v1010_v12 = vld [vmem:[#allocation5 + $0x30] sm:$0xff]   ;;  %p1107_p11 = scmp.ne.s32.totalorder %s1518_s30, %s1106_s12  ;;  %p1584_p0 = scmp.ne.s32.totalorder %s1579_s23, 0 }
  0x6e   : > { %v1009_v10 = vld [vmem:[#allocation5 + $0x28] sm:$0xff]   ;;  %899 = vmatprep.subr.bf16.mxu1 %v1012_v8  ;;  %v1015_v13 = vld [vmem:[#allocation7 + $0x18] sm:$0xff]   ;;  %v1016_v15 = vld [vmem:[#allocation7 + $0x20] sm:$0xff]   ;;  %s1185_s13 = smov [#allocation8]  }
  0x6f   : > { %883 = vmatprep.mubr.bf16.mxu0 %v291_v6  ;;  %900 = vmatpush3.bf16.msra.mxu1 %v1012_v8  ;;  %v1011_v14 = vld [vmem:[#allocation5 + $0x38] sm:$0xff]   ;;  %v277_v16 = vld [vmem:[%s1396_s6 + $0x10] sm:$0xff]  ;;  %v1417_v18 = vld [vmem:[%s1396_s6 + $0x20] sm:$0xff]  ;;  %p1108_p1 = pnand %p1107_p11, %p1584_p0  ;;  %s1110_s17 = sshll.u32 %s1185_s13, 4  ;;  %s1111_s17 = int_to_ptr.vmem [resolvable:$false] %s1110_s17 }
  0x70   : > { %870 = vmatpush3.bf16.msra.mxu0 %v1005_v1  ;;  %901 = vmatprep.subr.bf16.mxu1 %v1013_v9  ;;  %v278_v17 = vld [vmem:[%s1396_s6 + $0x18] sm:$0xff]  ;;  %v1420_v19 = vld [vmem:[%s1396_s6 + $0x28] sm:$0xff]  ;;  %v281_v22 = vld [vmem:[%s1396_s6 + $0x30] sm:$0xff]  ;;  %s1112_s7 = scalar_lea.vmem %s1111_s17, 4096  ;;  %p1113_p7 = scmp.lt.s32.totalorder %s1518_s30, %s1111_s17 }
  0x71   : > { %871 = vmatprep.subr.bf16.mxu0 %v1006_v2  ;;  %v292_v20 = vpack.c.bf16 %v278_v17, %v277_v16  ;;  %v293_v21 = vpack.c.bf16 %v1420_v19, %v1417_v18  ;;  %v282_v23 = vld [vmem:[%s1396_s6 + $0x38] sm:$0xff]  ;;  %v1427_v24 = vld [vmem:[%s1396_s6 + $0x40] sm:$0xff]  ;;  %v1430_v25 = vld [vmem:[%s1396_s6 + $0x48] sm:$0xff]  ;;  %p1109_p3 = pneg %p1108_p1  ;;  %p1114_p9 = scmp.lt.s32.totalorder %s1112_s7, %s1106_s12 }
  0x72   : > { %v294_v26 = vpack.c.bf16 %v282_v23, %v281_v22  ;;  %v295_v27 = vpack.c.bf16 %v1430_v25, %v1427_v24  ;;  %v1435_v28 = vld [vmem:[%s1396_s6 + $0x50] sm:$0xff]  ;;  %v1438_v29 = vld [vmem:[%s1396_s6 + $0x58] sm:$0xff]  ;;  %v1441_v30 = vld [vmem:[%s1396_s6 + $0x60] sm:$0xff] }
  0x73   : > { %902 = vmatpush3.bf16.msra.mxu1 %v1013_v9  ;;  %v1444_v31 = vld [vmem:[%s1396_s6 + $0x68] sm:$0xff]  ;;  %v296_v32 = vpack.c.bf16 %v1438_v29, %v1435_v28  ;;  %v1451_v34 = vld [vmem:[%s1396_s6 + $0x70] sm:$0xff]  ;;  %v1454_v35 = vld [vmem:[%s1396_s6 + $0x78] sm:$0xff]  ;;  %p1115_p12 = por %p1114_p9, %p1113_p7 }
  0x74   : > { %872 = vmatpush3.bf16.msra.mxu0 %v1006_v2  ;;  %903 = vmatprep.subr.bf16.mxu1 %v1014_v11  ;;  %v297_v33 = vpack.c.bf16 %v1444_v31, %v1441_v30  ;;  %v298_v36 = vpack.c.bf16 %v1454_v35, %v1451_v34  ;;  %v1017_v37 = vld [vmem:[#allocation7 + $0x28] sm:$0xff]   ;;  %v1018_v38 = vld [vmem:[#allocation7 + $0x30] sm:$0xff]   ;;  %v1019_v39 = vld [vmem:[#allocation7 + $0x38] sm:$0xff]  }
  0x75   : > { %873 = vmatprep.subr.bf16.mxu0 %v1007_v3  ;;  %v1461_v40 = vld [vmem:[%s1567_s2] ss:$0 sm:$0xff]  ;;  %p1116_p2 = pnand %p1115_p12, %p1109_p3 }
  0x77   : > { %904 = vmatpush3.bf16.msra.mxu1 %v1014_v11 }
  0x78   : > { %874 = vmatpush3.bf16.msra.mxu0 %v1007_v3  ;;  %905 = vmatprep.subr.bf16.mxu1 %v1015_v13 }
  0x79   : > { %875 = vmatprep.subr.bf16.mxu0 %v1008_v7 }
  0x7b   : > { %906 = vmatpush3.bf16.msra.mxu1 %v1015_v13 }
  0x7c   : > { %876 = vmatpush3.bf16.msra.mxu0 %v1008_v7  ;;  %907 = vmatprep.subr.bf16.mxu1 %v1016_v15 }
  0x7d   : > { %877 = vmatprep.subr.bf16.mxu0 %v1009_v10 }
  0x7f   : > { %908 = vmatpush3.bf16.msra.mxu1 %v1016_v15 }
  0x80   : > { %878 = vmatpush3.bf16.msra.mxu0 %v1009_v10  ;;  %909 = vmatprep.subr.bf16.mxu1 %v1017_v37 }
  0x81   : > { %879 = vmatprep.subr.bf16.mxu0 %v1010_v12 }
  0x83   : > { %910 = vmatpush3.bf16.msra.mxu1 %v1017_v37 }
  0x84   : > { %880 = vmatpush3.bf16.msra.mxu0 %v1010_v12  ;;  %911 = vmatprep.subr.bf16.mxu1 %v1018_v38 }
  0x85   : > { %881 = vmatprep.subr.bf16.mxu0 %v1011_v14 }
  0x87   : > { %912 = vmatpush3.bf16.msra.mxu1 %v1018_v38 }
  0x88   : > { %882 = vmatpush3.bf16.msra.mxu0 %v1011_v14  ;;  %913 = vmatprep.subr.bf16.mxu1 %v1019_v39 }
  0x8b   : > { %884 = vmatmul.mubr.bf16.vlgmr.msra.gmra.mrb[0].mxu0 %v292_v20  ;;  %914 = vmatpush3.bf16.msra.mxu1 %v1019_v39 }
  0x8c   : > { %887 = vmatprep.mubr.bf16.mxu0 %v293_v21 }
  0x93   : > { %888 = vmatmul.mubr.bf16.gmra.mrb[4].mxu0 %v294_v26 }
  0x94   : > { %891 = vmatprep.mubr.bf16.mxu0 %v295_v27 }
  0x9b   : > { %892 = vmatmul.mubr.bf16.gmra.mrb[8].mxu0 %v296_v32 }
  0x9c   : > { %895 = vmatprep.mubr.bf16.mxu0 %v297_v33 }
  0xa3   : > { %896 = vmatmul.mubr.bf16.gmra.mrb[12].mxu0 %v298_v36 }
 0x15e   : > { %v885_v41 = vpop.f32.mrb[0].mxu0 }
 0x15f   : > { %v413_v42 = vadd.f32 %v885_v41, %v1461_v40  ;;  %v404_v43 = vpop.f32.mrb[1].mxu0 }
 0x160   : > { %v405_v44 = vadd.f32 %v1461_v40, %v404_v43  ;;  %v886_v45 = vpop.f32.mrb[2].mxu0 }
 0x161   : > { %v469_v46 = vmax.f32 %v413_v42, 0.0  ;;  %v416_v47 = vadd.f32 %v886_v45, %v1461_v40  ;;  %v407_v48 = vpop.f32.mrb[3].mxu0 }
 0x162   : > { %v467_v49 = vmax.f32 %v405_v44, 0.0  ;;  %v408_v50 = vadd.f32 %v1461_v40, %v407_v48 }
 0x163   : > { %v470_v51 = vmax.f32 %v416_v47, 0.0  ;;  %v485_v53 = vadd.f32 %v469_v46, %v277_v16 }
 0x164   : > { %v468_v52 = vmax.f32 %v408_v50, 0.0  ;;  %v483_v56 = vadd.f32 %v467_v49, %v1407_v4 }
 0x165   : > { %v486_v54 = vadd.f32 %v470_v51, %v278_v17 }
 0x166   : > { %v889_v55 = vpop.f32.mrb[4].mxu0  ;;  %v484_v57 = vadd.f32 %v468_v52, %v1410_v5 }
 0x167   : > { %v429_v58 = vadd.f32 %v889_v55, %v1461_v40  ;;  %v420_v59 = vpop.f32.mrb[5].mxu0  ;;  %v500_v60 = vpack.c.bf16 %v486_v54, %v485_v53 }
 0x168   : > { %v421_v61 = vadd.f32 %v1461_v40, %v420_v59  ;;  %v890_v62 = vpop.f32.mrb[6].mxu0  ;;  %v499_v63 = vpack.c.bf16 %v484_v57, %v483_v56 }
 0x169   : > { %v473_v0 = vmax.f32 %v429_v58, 0.0  ;;  %v432_v1 = vadd.f32 %v890_v62, %v1461_v40  ;;  %v423_v2 = vpop.f32.mrb[7].mxu0 }
 0x16a   : > { %v471_v3 = vmax.f32 %v421_v61, 0.0  ;;  %v424_v6 = vadd.f32 %v1461_v40, %v423_v2  ;;  %915 = vmatprep.mubr.bf16.mxu1 %v499_v63 }
 0x16b   : > { %v474_v7 = vmax.f32 %v432_v1, 0.0  ;;  %916 = vmatmul.mubr.bf16.vlgmr.msra.gmra.mrb[0].mxu1 %v500_v60  ;;  %v489_v5 = vadd.f32 %v473_v0, %v281_v22 }
 0x16c   : > { %v472_v4 = vmax.f32 %v424_v6, 0.0  ;;  %v487_v9 = vadd.f32 %v471_v3, %v1417_v18 }
 0x16d   : > { %v490_v8 = vadd.f32 %v474_v7, %v282_v23 }
 0x16e   : > { %v488_v10 = vadd.f32 %v472_v4, %v1420_v19  ;;  %v893_v11 = vpop.f32.mrb[8].mxu0 }
 0x16f   : > { %v445_v12 = vadd.f32 %v893_v11, %v1461_v40  ;;  %v436_v13 = vpop.f32.mrb[9].mxu0  ;;  %v502_v14 = vpack.c.bf16 %v490_v8, %v489_v5 }
 0x170   : > { %v437_v15 = vadd.f32 %v1461_v40, %v436_v13  ;;  %v894_v16 = vpop.f32.mrb[10].mxu0  ;;  %v501_v17 = vpack.c.bf16 %v488_v10, %v487_v9 }
 0x171   : > { %v477_v20 = vmax.f32 %v445_v12, 0.0  ;;  %v448_v21 = vadd.f32 %v894_v16, %v1461_v40  ;;  %v439_v26 = vpop.f32.mrb[11].mxu0 }
 0x172   : > { %v475_v27 = vmax.f32 %v437_v15, 0.0  ;;  %v440_v22 = vadd.f32 %v1461_v40, %v439_v26  ;;  %919 = vmatprep.mubr.bf16.mxu1 %v501_v17 }
 0x173   : > { %v478_v18 = vmax.f32 %v448_v21, 0.0  ;;  %920 = vmatmul.mubr.bf16.gmra.mrb[4].mxu1 %v502_v14  ;;  %v493_v23 = vadd.f32 %v477_v20, %v1435_v28 }
 0x174   : > { %v476_v19 = vmax.f32 %v440_v22, 0.0  ;;  %v491_v33 = vadd.f32 %v475_v27, %v1427_v24 }
 0x175   : > { %v494_v32 = vadd.f32 %v478_v18, %v1438_v29 }
 0x176   : > { %v492_v36 = vadd.f32 %v476_v19, %v1430_v25  ;;  %v897_v37 = vpop.f32.mrb[12].mxu0 }
 0x177   : > { %v461_v38 = vadd.f32 %v897_v37, %v1461_v40  ;;  %v452_v39 = vpop.f32.mrb[13].mxu0  ;;  %v504_v41 = vpack.c.bf16 %v494_v32, %v493_v23 }
 0x178   : > { %v453_v42 = vadd.f32 %v1461_v40, %v452_v39  ;;  %v898_v43 = vpop.f32.mrb[14].mxu0  ;;  %v503_v44 = vpack.c.bf16 %v492_v36, %v491_v33 }
 0x179   : > { %v481_v45 = vmax.f32 %v461_v38, 0.0  ;;  %v464_v46 = vadd.f32 %v898_v43, %v1461_v40  ;;  %v455_v47 = vpop.f32.mrb[15].mxu0 }
 0x17a   : > { %v479_v28 = vmax.f32 %v453_v42, 0.0  ;;  %v456_v29 = vadd.f32 %v1461_v40, %v455_v47  ;;  %923 = vmatprep.mubr.bf16.mxu1 %v503_v44  ;;  %v819_v40 = vld [vmem:[%s1569_s4] ss:$0 sm:$0xff] }
 0x17b   : > { %v482_v24 = vmax.f32 %v464_v46, 0.0  ;;  %924 = vmatmul.mubr.bf16.gmra.mrb[8].mxu1 %v504_v41  ;;  %v497_v48 = vadd.f32 %v481_v45, %v1451_v34 }
 0x17c   : > { %v480_v25 = vmax.f32 %v456_v29, 0.0  ;;  %v495_v50 = vadd.f32 %v479_v28, %v1441_v30 }
 0x17d   : > { %v498_v49 = vadd.f32 %v482_v24, %v1454_v35 }
 0x17e   : > { %v496_v51 = vadd.f32 %v480_v25, %v1444_v31 }
 0x17f   : > { %v506_v52 = vpack.c.bf16 %v498_v49, %v497_v48 }
 0x180   : > { %v505_v53 = vpack.c.bf16 %v496_v51, %v495_v50 }
 0x182   : > { %927 = vmatprep.mubr.bf16.mxu1 %v505_v53 }
 0x183   : > { %928 = vmatmul.mubr.bf16.gmra.mrb[12].mxu1 %v506_v52 }
 0x23e   : > { %v917_v54 = vpop.f32.mrb[0].mxu1 }
 0x23f   : > { %v621_v55 = vadd.f32 %v917_v54, %v819_v40  ;;  %v612_v56 = vpop.f32.mrb[1].mxu1 }
 0x240   : > { %v613_v57 = vadd.f32 %v819_v40, %v612_v56  ;;  %v918_v58 = vpop.f32.mrb[2].mxu1 }
 0x241   : > { %677 = vst [vmem:[%s1496_s11 + $0x10] sm:$0xff] %v621_v55  ;;  %v624_v30 = vadd.f32 %v918_v58, %v819_v40  ;;  %v615_v31 = vpop.f32.mrb[3].mxu1 }
 0x242   : > { %675 = vst [vmem:[%s1496_s11] sm:$0xff] %v613_v57  ;;  %v616_v34 = vadd.f32 %v819_v40, %v615_v31 }
 0x243   : > { %678 = vst [vmem:[%s1496_s11 + $0x18] sm:$0xff] %v624_v30 }
 0x244   : > { %676 = vst [vmem:[%s1496_s11 + $0x8] sm:$0xff] %v616_v34 }
 0x246   : > { %v921_v35 = vpop.f32.mrb[4].mxu1 }
 0x247   : > { %v637_v59 = vadd.f32 %v921_v35, %v819_v40  ;;  %v628_v60 = vpop.f32.mrb[5].mxu1 }
 0x248   : > { %v629_v61 = vadd.f32 %v819_v40, %v628_v60  ;;  %v922_v62 = vpop.f32.mrb[6].mxu1 }
 0x249   : > { %681 = vst [vmem:[%s1496_s11 + $0x30] sm:$0xff] %v637_v59  ;;  %v640_v63 = vadd.f32 %v922_v62, %v819_v40  ;;  %v631_v0 = vpop.f32.mrb[7].mxu1 }
 0x24a   : > { %679 = vst [vmem:[%s1496_s11 + $0x20] sm:$0xff] %v629_v61  ;;  %v632_v1 = vadd.f32 %v819_v40, %v631_v0 }
 0x24b   : > { %682 = vst [vmem:[%s1496_s11 + $0x38] sm:$0xff] %v640_v63 }
 0x24c   : > { %680 = vst [vmem:[%s1496_s11 + $0x28] sm:$0xff] %v632_v1 }
 0x24e   : > { %v925_v2 = vpop.f32.mrb[8].mxu1 }
 0x24f   : > { %v653_v3 = vadd.f32 %v925_v2, %v819_v40  ;;  %v644_v6 = vpop.f32.mrb[9].mxu1 }
 0x250   : > { %v645_v7 = vadd.f32 %v819_v40, %v644_v6  ;;  %v926_v4 = vpop.f32.mrb[10].mxu1 }
 0x251   : > { %685 = vst [vmem:[%s1496_s11 + $0x50] sm:$0xff] %v653_v3  ;;  %v656_v5 = vadd.f32 %v926_v4, %v819_v40  ;;  %v647_v8 = vpop.f32.mrb[11].mxu1 }
 0x252   : > { %683 = vst [vmem:[%s1496_s11 + $0x40] sm:$0xff] %v645_v7  ;;  %v648_v9 = vadd.f32 %v819_v40, %v647_v8 }
 0x253   : > { %686 = vst [vmem:[%s1496_s11 + $0x58] sm:$0xff] %v656_v5 }
 0x254   : > { %684 = vst [vmem:[%s1496_s11 + $0x48] sm:$0xff] %v648_v9 }
 0x256   : > { %v929_v10 = vpop.f32.mrb[12].mxu1 }
 0x257   : > { %v669_v11 = vadd.f32 %v929_v10, %v819_v40  ;;  %v660_v12 = vpop.f32.mrb[13].mxu1 }
 0x258   : > { %v661_v13 = vadd.f32 %v819_v40, %v660_v12  ;;  %v930_v14 = vpop.f32.mrb[14].mxu1 }
 0x259   : > { %689 = vst [vmem:[%s1496_s11 + $0x70] sm:$0xff] %v669_v11  ;;  %v672_v15 = vadd.f32 %v930_v14, %v819_v40  ;;  %v663_v16 = vpop.f32.mrb[15].mxu1 }
 0x25a   : > { %687 = vst [vmem:[%s1496_s11 + $0x60] sm:$0xff] %v661_v13  ;;  %v664_v17 = vadd.f32 %v819_v40, %v663_v16 }
 0x25b   : > { %690 = vst [vmem:[%s1496_s11 + $0x78] sm:$0xff] %v672_v15 }
 0x25c   : > { %688 = vst [vmem:[%s1496_s11 + $0x68] sm:$0xff] %v664_v17 }
 0x25d   : > { %1119 = shalt.err (!%p1116_p2)
}
 0x25e   : > { %s1120_s6 = scalar_lea.hbm %s1516_s9, 2048  ;;  %s1124_s8 = scalar_lea.hbm %s1570_s5, 4096 }
 0x25f   : > { %p1121_p13 = scmp.ne.s32.totalorder %s1516_s9, %s1120_s6  ;;  %p1125_p4 = scmp.lt.u32.totalorder %s1516_s9, %s1570_s5 }
 0x260   : > { %p1126_p5 = scmp.lt.u32.totalorder %s1124_s8, %s1120_s6  ;;  %p1128_p11 = scmp.lt.u32.totalorder %s1120_s6, %s1516_s9 }
 0x261   : > { %p1122_p6 = pnand %p1121_p13, %p1584_p0 }
 0x262   : > { %p1127_p8 = por %p1126_p5, %p1125_p4 }
 0x263   : > { %p1123_p10 = pneg %p1122_p6 }
 0x264   : > { %p1129_p1 = por %p1128_p11, %p1127_p8 }
 0x266   : > { %p1130_p3 = pnand %p1129_p1, %p1123_p10 }
 0x268   : > { %1133 = shalt.err (!%p1130_p3)
}
 0x269   : > { %s1186_s28 = smov 128   ;;  %s1187_s15 = smov 8  }
 0x26a   : > { %941 = dma.vmem_to_hbm [thread:$0]  (%p1584_p0), %s1518_s30, 2048, %s1516_s9, %s692_s22, %s1186_s28, %s1186_s28, %s1187_s15  }
 0x26b PF: > { %s720_s16 = sand.u32 1, %s1164_s18   ;;  %p1585_p7 = scmp.ne.s32.totalorder %s1575_s25, 0 }
 0x26c   : > { %p1586_p9 = scmp.ge.s32.totalorder %s1176_s21, 2  ;;  %s721_s12 = scalar_lea.sflag [#allocation4], %s720_s16 }
 0x26e   : > { %p955_p12 = pnand %p1586_p9, %p1585_p7 }
 0x270   : > { %1159 = dma.done.wait (!%p955_p12), %s721_s12, 2048  }
 0x271   : > { %1161 = vsyncadd (!%p955_p12), %s721_s12, 4294965248  ;;  %p19_p2 = scmp.ge.s32.totalorder %s1328_s14, 4   ;;  %s1587_s18 = smov %s1168_s19 }
 0x272   : > { %s1588_s19 = smov %s1172_s20  ;;  %s1589_s20 = smov %s1344_s27 }
 0x273   : > { %s1590_s21 = smov %s1328_s14  ;;  %21 = sbr.rel (!%p19_p2) target bundleno = 6 (0x6), region = 93 }
 0x27a   :  { %726 = vsyncpa [#allocation3], 1 }
 0x27b   :  { %728 = vsyncpa [#allocation3 + $0x1], 1 }
 0x27c   :  { %729 = vsyncpa [#allocation6], 1 }
 0x27d   :  { %730 = vsyncpa [#allocation4], 1 }
 0x27e   :  { %732 = vsyncpa [#allocation4 + $0x1], 1 }

</bundles_post_ra>
